<compile_context>
chip_gen: v7x
topology: tpu7x:2x2x1
jax: 0.10.0
libtpu: 0.0.40
codegen_flags: <defaults>
</compile_context>

<pallas_src>
import functools

import jax
import jax.numpy as jnp
from jax.experimental import pallas as pl
from jax.experimental.pallas import tpu as pltpu

BN_EPS = 1e-5
LANE = 128
SMALL_BATCH_FALLBACK = 256   # below this, fused XLA beats a 1-step pallas_call
MIN_GRID_STEPS = 4           # v7x megacore sharding + per-core pipeline overlap


def _cdiv(a, b):
    return (a + b - 1) // b


def _round_up(n, m):
    return _cdiv(n, m) * m


def _vmem_cap_bytes():
    # Physical VMEM of the current chip (64 MiB on v7x, 128 MiB on v5e/v6e).
    try:
        return int(pltpu.get_tpu_info().vmem_capacity_bytes)
    except Exception:
        return 128 << 20


def _make_kernel(return_feature):
    def kernel(x_ref, w1_ref, b1_ref, w2_ref, b2_ref, cls_ref, *maybe_feat):
        # fc1 (BatchNorm folded into w1/b1): Linear(F -> H).  MXU, f32 acc.
        feat = jnp.dot(x_ref[...], w1_ref[...],
                       preferred_element_type=jnp.float32) + b1_ref[...]
        if return_feature:
            maybe_feat[0][...] = feat.astype(maybe_feat[0].dtype)

        # fc2: ReLU -> [Dropout = identity in eval] -> Linear(H -> C_pad).
        # ReLU / bias stay in f32; only the dot operands are down-cast.
        h = jnp.maximum(feat, 0.0).astype(w2_ref.dtype)
        cls = jnp.dot(h, w2_ref[...],
                      preferred_element_type=jnp.float32) + b2_ref[...]
        cls_ref[...] = cls.astype(cls_ref.dtype)

    return kernel


@functools.partial(
    jax.jit,
    static_argnames=("use_bf16", "bf16_out", "return_feature", "block_rows",
                     "force_pallas"))
def mlp_forward(x, params, *, use_bf16=True, bf16_out=True,
                return_feature=True, block_rows=4096, force_pallas=False):
    """Returns (x_class, x_feature) like the PyTorch module (or x_class only
    when return_feature=False)."""
    B, F = x.shape
    H = params["w1"].shape[1]
    C = params["w2"].shape[1]

    # ---- Fold BatchNorm1d (running stats) into fc1's Linear, all in f32.
    scale = params["gamma"] * jax.lax.rsqrt(params["running_var"] + BN_EPS)  # (1, F)
    shift = params["beta"] - params["running_mean"] * scale                  # (1, F)
    w1 = params["w1"] * scale.reshape(F, 1)                                  # (F, H)
    b1 = (params["b1"] + jnp.dot(shift, params["w1"],
                                 precision=jax.lax.Precision.HIGHEST)
          ).astype(jnp.float32)                                              # (1, H)
    b2 = params["b2"].astype(jnp.float32)                                    # (1, C)

    op_dtype = jnp.bfloat16 if use_bf16 else jnp.float32
    out_dtype = jnp.bfloat16 if bf16_out else jnp.float32
    x_op = x.astype(op_dtype)
    w1_op = w1.astype(op_dtype)
    w2_op = params["w2"].astype(op_dtype)

    # ---- Small-batch fallback: let XLA fuse the two tiny matmuls.
    if B < SMALL_BATCH_FALLBACK and not force_pallas:
        feat = jnp.dot(x_op, w1_op, preferred_element_type=jnp.float32) + b1
        cls = jnp.dot(jnp.maximum(feat, 0.0).astype(op_dtype), w2_op,
                      preferred_element_type=jnp.float32) + b2
        cls = cls.astype(out_dtype)
        if return_feature:
            return cls, feat.astype(out_dtype)
        return cls

    # ---- Lane-dense class dim: pad to a multiple of 128 with zero columns.
    C_pad = _round_up(C, LANE)
    w2_pad = jnp.pad(w2_op, ((0, 0), (0, C_pad - C)))
    b2_pad = jnp.pad(b2, ((0, 0), (0, C_pad - C)))

    # ---- Batch tiling: bound padding waste to < one sublane group per tile,
    # force >= MIN_GRID_STEPS steps when possible (v7x 2-TC sharding).
    sublane = 16 if use_bf16 else 8      # bf16 packs 16 sublanes per vreg
    num_tiles = max(_cdiv(B, block_rows), 1)
    if B >= MIN_GRID_STEPS * sublane:
        num_tiles = max(num_tiles, MIN_GRID_STEPS)
    TB = _round_up(_cdiv(B, num_tiles), sublane)
    num_tiles = _cdiv(B, TB)             # re-derive: never an all-padding tile
    B_pad = num_tiles * TB
    if B_pad != B:
        # NOTE: padded rows end up as feat = b1 (bias still added); they are
        # sliced off below and must never be consumed.
        x_op = jnp.pad(x_op, ((0, B_pad - B), (0, 0)))

    item_in = jnp.dtype(op_dtype).itemsize
    item_out = jnp.dtype(out_dtype).itemsize

    # ---- Advisory cost + footprint-derived VMEM limit.
    out_bytes = B_pad * C_pad * item_out
    if return_feature:
        out_bytes += B_pad * H * item_out
    weight_bytes = (F * H + H * C_pad) * item_in + (H + C_pad) * 4
    bytes_accessed = B_pad * F * item_in + weight_bytes + out_bytes
    cost = pl.CostEstimate(
        flops=2 * B_pad * F * H + 2 * B_pad * H * C_pad,
        transcendentals=0,
        bytes_accessed=bytes_accessed,
    )

    tile_bytes = TB * F * item_in + TB * C_pad * item_out
    if return_feature:
        tile_bytes += TB * H * item_out
    vmem_needed = 2 * (tile_bytes + weight_bytes) + (4 << 20)  # dbl-buf + slack
    vmem_cap = min(96 << 20, int(0.75 * _vmem_cap_bytes()))
    vmem_limit = min(max(32 << 20, vmem_needed), vmem_cap)

    out_shapes = [jax.ShapeDtypeStruct((B_pad, C_pad), out_dtype)]   # x_class
    out_specs = [pl.BlockSpec((TB, C_pad), lambda i: (i, 0))]
    if return_feature:
        out_shapes.append(jax.ShapeDtypeStruct((B_pad, H), out_dtype))  # x_feature
        out_specs.append(pl.BlockSpec((TB, H), lambda i: (i, 0)))

    outs = pl.pallas_call(
        _make_kernel(return_feature),
        out_shape=tuple(out_shapes),
        grid_spec=pltpu.PrefetchScalarGridSpec(
            num_scalar_prefetch=0,
            grid=(num_tiles,),
            in_specs=[
                pl.BlockSpec((TB, F), lambda i: (i, 0)),      # x: tiled on batch
                pl.BlockSpec((F, H), lambda i: (0, 0)),       # w1: VMEM-resident
                pl.BlockSpec((1, H), lambda i: (0, 0)),       # b1
                pl.BlockSpec((H, C_pad), lambda i: (0, 0)),   # w2
                pl.BlockSpec((1, C_pad), lambda i: (0, 0)),   # b2
            ],
            out_specs=out_specs,
        ),
        compiler_params=pltpu.CompilerParams(
            dimension_semantics=("parallel",),
            vmem_limit_bytes=vmem_limit,
        ),
        cost_estimate=cost,
    )(x_op, w1_op, b1, w2_pad, b2_pad)

    if return_feature:
        cls_pad, feat_pad = outs
        return cls_pad[:B, :C], feat_pad[:B, :]
    (cls_pad,) = outs
    return cls_pad[:B, :C]


def init_params(key, feature_dim, hidden, num_classes):
    k1, k2, k3, k4, k5 = jax.random.split(key, 5)
    params = {
        # BatchNorm1d(feature_dim) parameters / running stats, kept as (1, F)
        "gamma": jnp.ones((1, feature_dim), jnp.float32),
        "beta": jnp.zeros((1, feature_dim), jnp.float32),
        "running_mean": 0.1 * jax.random.normal(k1, (1, feature_dim), jnp.float32),
        "running_var": jnp.abs(jax.random.normal(k2, (1, feature_dim), jnp.float32)) + 1.0,
        # Linear(feature_dim, 128): stored as (F, 128) = W^T
        "w1": 0.05 * jax.random.normal(k3, (feature_dim, hidden), jnp.float32),
        "b1": 0.01 * jnp.ones((1, hidden), jnp.float32),
        # Linear(128, num_classes): stored as (128, C) = W^T
        "w2": 0.05 * jax.random.normal(k4, (hidden, num_classes), jnp.float32),
        "b2": 0.01 * jnp.ones((1, num_classes), jnp.float32),
    }
    return params, k5


def reference_forward(x, p):
    inv_std = jax.lax.rsqrt(p["running_var"] + BN_EPS)
    x_bn = (x - p["running_mean"]) * inv_std * p["gamma"] + p["beta"]
    feat = x_bn @ p["w1"] + p["b1"]
    cls = jnp.maximum(feat, 0.0) @ p["w2"] + p["b2"]
    return cls, feat


if __name__ == "__main__":
    FEATURE_DIM, HIDDEN, NUM_CLASSES = 32, 128, 10

    key = jax.random.PRNGKey(0)
    params, key = init_params(key, FEATURE_DIM, HIDDEN, NUM_CLASSES)

    # ---- Batch large enough to take the Pallas path (4 grid steps of 128).
    kx, key = jax.random.split(key)
    x_big = jax.random.normal(kx, (512, FEATURE_DIM), jnp.float32)
    ref_cls, ref_feat = reference_forward(x_big, params)

    # f32 operands + f32 outputs: should match the reference closely.
    cls_f32, feat_f32 = jax.block_until_ready(
        mlp_forward(x_big, params, use_bf16=False, bf16_out=False))
    assert cls_f32.shape == (512, NUM_CLASSES) and cls_f32.dtype == jnp.float32
    assert feat_f32.shape == (512, HIDDEN)
    assert jnp.allclose(cls_f32, ref_cls, atol=1e-3, rtol=1e-3)
    assert jnp.allclose(feat_f32, ref_feat, atol=1e-3, rtol=1e-3)

    # Default path: bf16 operands + bf16 output stores (f32 MXU accumulate).
    cls_bf, feat_bf = jax.block_until_ready(mlp_forward(x_big, params))
    assert cls_bf.shape == (512, NUM_CLASSES) and cls_bf.dtype == jnp.bfloat16
    assert feat_bf.shape == (512, HIDDEN) and feat_bf.dtype == jnp.bfloat16
    assert jnp.allclose(cls_bf.astype(jnp.float32), ref_cls, atol=3e-2, rtol=3e-2)
    assert jnp.allclose(feat_bf.astype(jnp.float32), ref_feat, atol=3e-2, rtol=3e-2)

    # Class-only path (skips the x_feature writeback entirely).
    cls_only = jax.block_until_ready(
        mlp_forward(x_big, params, return_feature=False))
    assert cls_only.shape == (512, NUM_CLASSES)
    assert jnp.allclose(cls_only.astype(jnp.float32), ref_cls, atol=3e-2, rtol=3e-2)

    # ---- Tiny batch (PyTorch-demo scale): exercises the XLA small-batch
    # fallback and the forced single-tile Pallas path.
    kx2, key = jax.random.split(key)
    x_small = jax.random.normal(kx2, (8, FEATURE_DIM), jnp.float32)
    ref_cls_s, ref_feat_s = reference_forward(x_small, params)

    cls_s, feat_s = jax.block_until_ready(
        mlp_forward(x_small, params, use_bf16=False, bf16_out=False))
    assert jnp.allclose(cls_s, ref_cls_s, atol=1e-3, rtol=1e-3)
    assert jnp.allclose(feat_s, ref_feat_s, atol=1e-3, rtol=1e-3)

    cls_sp, feat_sp = jax.block_until_ready(
        mlp_forward(x_small, params, use_bf16=False, bf16_out=False,
                    force_pallas=True))
    assert jnp.allclose(cls_sp, ref_cls_s, atol=1e-3, rtol=1e-3)
    assert jnp.allclose(feat_sp, ref_feat_s, atol=1e-3, rtol=1e-3)

    print("KERNEL_OK")
</pallas_src>

<mosaic_0001>
module attributes {stable_mosaic.version = 11 : i64} {
  func.func @kernel(%arg0: i32, %arg1: memref<128x32xf32, #tpu.memory_space<vmem>>, %arg2: memref<32x128xf32, #tpu.memory_space<vmem>>, %arg3: memref<1x128xf32, #tpu.memory_space<vmem>>, %arg4: memref<128x128xf32, #tpu.memory_space<vmem>>, %arg5: memref<1x128xf32, #tpu.memory_space<vmem>>, %arg6: memref<128x128xf32, #tpu.memory_space<vmem>>, %arg7: memref<128x128xf32, #tpu.memory_space<vmem>>) attributes {dimension_semantics = [#tpu.dimension_semantics<parallel>], iteration_bounds = array<i64: 4>, scalar_prefetch = 0 : i64, scratch_operands = 0 : i64, tpu.core_type = #tpu.core_type<tc>, window_params = [{transform_indices = @transform_0, window_bounds = array<i64: 128, 32>}, {pipeline_mode = #tpu.pipeline_mode<synchronous>, transform_indices = @transform_1, window_bounds = array<i64: 32, 128>}, {pipeline_mode = #tpu.pipeline_mode<synchronous>, transform_indices = @transform_2, window_bounds = array<i64: 1, 128>}, {pipeline_mode = #tpu.pipeline_mode<synchronous>, transform_indices = @transform_3, window_bounds = array<i64: 128, 128>}, {pipeline_mode = #tpu.pipeline_mode<synchronous>, transform_indices = @transform_4, window_bounds = array<i64: 1, 128>}, {transform_indices = @transform_5, window_bounds = array<i64: 128, 128>}, {transform_indices = @transform_6, window_bounds = array<i64: 128, 128>}]} {
    %c0 = arith.constant 0 : index
    %c0_0 = arith.constant 0 : index
    %0 = vector.load %arg1[%c0, %c0_0] : memref<128x32xf32, #tpu.memory_space<vmem>>, vector<128x32xf32>
    %c0_1 = arith.constant 0 : index
    %c0_2 = arith.constant 0 : index
    %1 = vector.load %arg2[%c0_1, %c0_2] : memref<32x128xf32, #tpu.memory_space<vmem>>, vector<32x128xf32>
    %cst = arith.constant dense<0.000000e+00> : vector<128x128xf32>
    %2 = tpu.matmul %0, %1, %cst {dimension_numbers = #tpu.dot_dimension_numbers<[1], [0], [0], [1], [0, 0, 1, 1], [], []>} : vector<128x32xf32>, vector<32x128xf32>, vector<128x128xf32> -> vector<128x128xf32>
    %c0_3 = arith.constant 0 : index
    %c0_4 = arith.constant 0 : index
    %3 = vector.load %arg3[%c0_3, %c0_4] : memref<1x128xf32, #tpu.memory_space<vmem>>, vector<1x128xf32>
    %4 = vector.broadcast %3 : vector<1x128xf32> to vector<128x128xf32>
    %5 = arith.addf %2, %4 : vector<128x128xf32>
    %c0_5 = arith.constant 0 : index
    %c0_6 = arith.constant 0 : index
    %6 = vector.load %arg7[%c0_5, %c0_6] : memref<128x128xf32, #tpu.memory_space<vmem>>, vector<128x128xf32>
    tpu.vector_store %arg7[%c0_5, %c0_6], %5 {strides = array<i32>} : memref<128x128xf32, #tpu.memory_space<vmem>>, vector<128x128xf32>,
    %cst_7 = arith.constant 0.000000e+00 : f32
    %7 = vector.broadcast %cst_7 : f32 to vector<128x128xf32>
    %8 = arith.maximumf %5, %7 : vector<128x128xf32>
    %c0_8 = arith.constant 0 : index
    %c0_9 = arith.constant 0 : index
    %9 = vector.load %arg4[%c0_8, %c0_9] : memref<128x128xf32, #tpu.memory_space<vmem>>, vector<128x128xf32>
    %cst_10 = arith.constant dense<0.000000e+00> : vector<128x128xf32>
    %10 = tpu.matmul %8, %9, %cst_10 {dimension_numbers = #tpu.dot_dimension_numbers<[1], [0], [0], [1], [0, 0, 1, 1], [], []>} : vector<128x128xf32>, vector<128x128xf32>, vector<128x128xf32> -> vector<128x128xf32>
    %c0_11 = arith.constant 0 : index
    %c0_12 = arith.constant 0 : index
    %11 = vector.load %arg5[%c0_11, %c0_12] : memref<1x128xf32, #tpu.memory_space<vmem>>, vector<1x128xf32>
    %12 = vector.broadcast %11 : vector<1x128xf32> to vector<128x128xf32>
    %13 = arith.addf %10, %12 : vector<128x128xf32>
    %c0_13 = arith.constant 0 : index
    %c0_14 = arith.constant 0 : index
    %14 = vector.load %arg6[%c0_13, %c0_14] : memref<128x128xf32, #tpu.memory_space<vmem>>, vector<128x128xf32>
    tpu.vector_store %arg6[%c0_13, %c0_14], %13 {strides = array<i32>} : memref<128x128xf32, #tpu.memory_space<vmem>>, vector<128x128xf32>,
    return
  }
  func.func @transform_0(%arg0: i32) -> (i32, i32) {
    %c0_i32 = arith.constant 0 : i32
    %c0_i32_0 = arith.constant 0 : i32
    return %arg0, %c0_i32 : i32, i32
  }
  func.func @transform_1(%arg0: i32) -> (i32, i32) {
    %c0_i32 = arith.constant 0 : i32
    %c0_i32_0 = arith.constant 0 : i32
    %c0_i32_1 = arith.constant 0 : i32
    return %c0_i32, %c0_i32_0 : i32, i32
  }
  func.func @transform_2(%arg0: i32) -> (i32, i32) {
    %c0_i32 = arith.constant 0 : i32
    %c0_i32_0 = arith.constant 0 : i32
    %c0_i32_1 = arith.constant 0 : i32
    return %c0_i32, %c0_i32_0 : i32, i32
  }
  func.func @transform_3(%arg0: i32) -> (i32, i32) {
    %c0_i32 = arith.constant 0 : i32
    %c0_i32_0 = arith.constant 0 : i32
    %c0_i32_1 = arith.constant 0 : i32
    return %c0_i32, %c0_i32_0 : i32, i32
  }
  func.func @transform_4(%arg0: i32) -> (i32, i32) {
    %c0_i32 = arith.constant 0 : i32
    %c0_i32_0 = arith.constant 0 : i32
    %c0_i32_1 = arith.constant 0 : i32
    return %c0_i32, %c0_i32_0 : i32, i32
  }
  func.func @transform_5(%arg0: i32) -> (i32, i32) {
    %c0_i32 = arith.constant 0 : i32
    %c0_i32_0 = arith.constant 0 : i32
    return %arg0, %c0_i32 : i32, i32
  }
  func.func @transform_6(%arg0: i32) -> (i32, i32) {
    %c0_i32 = arith.constant 0 : i32
    %c0_i32_0 = arith.constant 0 : i32
    return %arg0, %c0_i32 : i32, i32
  }
}

</mosaic_0001>

<bundles_post_ra>
// kernel: mlp_forward.1
= control target key start
LH: loop header
LB: loop body
LE: loop exit
PB: predicated region body
PF: predicated region fallthrough
CT: control target
= control target key end

     0   :  { %12 = vsyncpa [#allocation3], 0  ;;  %s1457_s0 = inlined_call_operand.vmem [shape: f32[512,32], index: 0, kind: input, shape index: {}]   ;;  %s1458_s1 = inlined_call_operand.vmem [shape: f32[32,128], index: 1, kind: input, shape index: {}]   ;;  %s1459_s2 = inlined_call_operand.vmem [shape: f32[1,128], index: 2, kind: input, shape index: {}]   ;;  %s1460_s3 = inlined_call_operand.vmem [shape: f32[128,128], index: 3, kind: input, shape index: {}]   ;;  %s1461_s4 = inlined_call_operand.vmem [shape: f32[1,128], index: 4, kind: input, shape index: {}]   ;;  %s1462_s5 = inlined_call_operand.vmem [shape: f32[512,128], index: 5, kind: output, shape index: {0}]   ;;  %s1463_s6 = inlined_call_operand.hbm [shape: f32[512,128], index: 6, kind: output, shape index: {1}]  }
   0x1   :  { %14 = vsyncpa [#allocation3 + $0x1], 0  ;;  %s1186_s21 = smov 0   ;;  %s1188_s22 = smov 0  }
   0x2   :  { %s1190_s23 = smov 0   ;;  %s1192_s24 = smov 0  }
   0x3 LB: > { %s1207_s25 = sadd.s32 4294967295, %s1146_s24   ;;  %s814_s26 = sadd.s32 4294967294, %s1146_s24   ;;  %s1146_s24 = sphi %s1192_s24, %s1469_s24   ;;  %s1142_s23 = sphi %s1190_s23, %s1468_s23   ;;  %s1138_s22 = sphi %s1188_s22, %s1467_s22   ;;  %s1134_s21 = sphi %s1186_s21, %s1466_s21  }
   0x4   : > { %s1211_s27 = sadd.s32 1, %s1146_s24   ;;  %s163_s28 = sadd.s32 1, %s1142_s23 }
   0x5   : > { %s160_s29 = ssub.s32 %s1146_s24, %s1211_s27  ;;  %p173_p0 = scmp.ne.s32.totalorder %s1142_s23, %s1138_s22 }
   0x6   : > { %p161_p1 = scmp.eq.s32.totalorder %s160_s29, 0  ;;  %p174_p2 = scmp.eq.s32.totalorder %s1207_s25, 3 }
   0x7   : > { %p179_p3 = scmp.ne.s32.totalorder %s1138_s22, %s1134_s21  ;;  %p180_p4 = scmp.eq.s32.totalorder %s814_s26, 3 }
   0x8   : > { %s1222_s30 = scalar_select %p161_p1, %s1142_s23, %s163_s28  }
   0x9   : > { %p1224_p5 = por %p174_p2, %p173_p0  ;;  %p1228_p6 = por %p180_p4, %p179_p3 }
   0xa   : > { %p817_p7 = scmp.ge.s32.totalorder %s1146_s24, 1  ;;  %p219_p8 = scmp.lt.s32.totalorder %s1146_s24, 5 }
   0xc   : > { %p220_p9 = pnand %p817_p7, %p219_p8 }
   0xd   : > { %v283_v0 = vld [vmem:[%s1458_s1] sm:$0xff] (!%p220_p9)  ;;  %v284_v1 = vld [vmem:[%s1458_s1 + $0x8] sm:$0xff] (!%p220_p9)  ;;  %v285_v2 = vld [vmem:[%s1458_s1 + $0x10] sm:$0xff] (!%p220_p9)  ;;  %s819_s15 = sshll.u32 (!%p220_p9), %s1207_s25, 4  ;;  %vm294_vm0 = vcmask (!%p220_p9), 261120   ;;  %s251_s14 = sand.u32 (!%p220_p9), 1, %s1138_s22  }
   0xe   : > { %223 = sbr.rel (%p220_p9) target bundleno = 488 (0x1e8), region = 40  ;;  %v987_v3 = vpack.c.bf16 (!%p220_p9), %v284_v1, %v283_v0  ;;  %v286_v4 = vld [vmem:[%s1458_s1 + $0x18] sm:$0xff] (!%p220_p9)  ;;  %p255_p10 = scmp.lt.s32.totalorder (!%p220_p9), %s819_s15, 63  ;;  %v520_v5 = vld [vmem:[%s1460_s3] sm:$0xff] (!%p220_p9)  ;;  %v521_v6 = vld [vmem:[%s1460_s3 + $0x8] sm:$0xff] (!%p220_p9) }
   0xf   : > { %v991_v7 = vpack.c.bf16 (!%p220_p9), %v286_v4, %v285_v2  ;;  %v995_v8 = vpack.c.bf16 (!%p220_p9), %v521_v6, %v520_v5  ;;  %v522_v9 = vld [vmem:[%s1460_s3 + $0x10] sm:$0xff] (!%p220_p9)  ;;  %v523_v10 = vld [vmem:[%s1460_s3 + $0x18] sm:$0xff] (!%p220_p9)  ;;  %v524_v12 = vld [vmem:[%s1460_s3 + $0x20] sm:$0xff] (!%p220_p9)  ;;  %s818_s16 = sshll.u32 (!%p220_p9), %s251_s14, 7  ;;  %s846_s20 = sshll.u32 (!%p220_p9), %s1207_s25, 11 }
  0x10   : > { %988 = vmatprep.subr.bf16.mxu0 (!%p220_p9), %v987_v3  ;;  %v999_v11 = vpack.c.bf16 (!%p220_p9), %v523_v10, %v522_v9  ;;  %v525_v13 = vld [vmem:[%s1460_s3 + $0x28] sm:$0xff] (!%p220_p9)  ;;  %v526_v18 = vld [vmem:[%s1460_s3 + $0x30] sm:$0xff] (!%p220_p9)  ;;  %v527_v19 = vld [vmem:[%s1460_s3 + $0x38] sm:$0xff] (!%p220_p9)  ;;  %s1347_s18 = scalar_lea.vmem (!%p220_p9), [#allocation2], %s818_s16  ;;  %s1384_s9 = scalar_lea.hbm (!%p220_p9), %s1463_s6, %s846_s20 }
  0x11   : > { %990 = vmatpush3.bf16.msra.mxu0 (!%p220_p9), %v987_v3  ;;  %1027 = vmatprep.subr.bf16.mxu1 (!%p220_p9), %v995_v8  ;;  %v1003_v16 = vpack.c.bf16 (!%p220_p9), %v525_v13, %v524_v12  ;;  %v1007_v21 = vpack.c.bf16 (!%p220_p9), %v527_v19, %v526_v18  ;;  %v528_v23 = vld [vmem:[%s1460_s3 + $0x40] sm:$0xff] (!%p220_p9)  ;;  %v529_v24 = vld [vmem:[%s1460_s3 + $0x48] sm:$0xff] (!%p220_p9)  ;;  %v530_v28 = vld [vmem:[%s1460_s3 + $0x50] sm:$0xff] (!%p220_p9)  ;;  %s727_s26 = sshll.u32 (!%p220_p9), %s1347_s18, 4  ;;  %s1390_s10 = scalar_lea.sflag (!%p220_p9), [#allocation3], %s251_s14  ;;  %s1386_s26 = int_to_ptr.vmem [resolvable:$true] %s727_s26 }
  0x12   : > { %992 = vmatprep.subr.bf16.mxu0 (!%p220_p9), %v991_v7  ;;  %1035 = vmatpush3.bf16.msra.mxu1 (!%p220_p9), %v995_v8  ;;  %v1011_v26 = vpack.c.bf16 (!%p220_p9), %v529_v24, %v528_v23  ;;  %v531_v29 = vld [vmem:[%s1460_s3 + $0x58] sm:$0xff] (!%p220_p9)  ;;  %v532_v33 = vld [vmem:[%s1460_s3 + $0x60] sm:$0xff] (!%p220_p9)  ;;  %v533_v34 = vld [vmem:[%s1460_s3 + $0x68] sm:$0xff] (!%p220_p9)  ;;  %s1084_s12 = scalar_lea.vmem (!%p220_p9), %s1386_s26, 2048  ;;  %s1148_s25 = smov (!%p220_p9), [#allocation2]  }
  0x13   : > { %1028 = vmatprep.subr.bf16.mxu1 (!%p220_p9), %v999_v11  ;;  %v1015_v31 = vpack.c.bf16 (!%p220_p9), %v531_v29, %v530_v28  ;;  %v1019_v36 = vpack.c.bf16 (!%p220_p9), %v533_v34, %v532_v33  ;;  %v534_v43 = vld [vmem:[%s1460_s3 + $0x70] sm:$0xff] (!%p220_p9)  ;;  %v535_v44 = vld [vmem:[%s1460_s3 + $0x78] sm:$0xff] (!%p220_p9)  ;;  %v1343_v46 = vld [vmem:[%s1459_s2] ss:$0 sm:$0xff] (!%p220_p9)  ;;  %p1085_p11 = scmp.ne.s32.totalorder (!%p220_p9), %s1386_s26, %s1084_s12  ;;  %s1088_s13 = sshll.u32 (!%p220_p9), %s1148_s25, 4  ;;  %s1089_s13 = int_to_ptr.vmem [resolvable:$false] %s1088_s13 }
  0x14   : > { %v1023_v45 = vpack.c.bf16 (!%p220_p9), %v535_v44, %v534_v43  ;;  %s1090_s16 = scalar_lea.vmem (!%p220_p9), %s1089_s13, 4096  ;;  %p1091_p0 = scmp.lt.s32.totalorder (!%p220_p9), %s1386_s26, %s1089_s13 }
  0x15   : > { %s1471_s15 = smov (!%p255_p10, %s819_s15), 63  ;;  %994 = vmatpush3.bf16.msra.mxu0 %v991_v7  ;;  %p1086_p12 = pnand %p1085_p11, %p1224_p5 }
  0x16   : > { %s820_s11 = sshll.u32 %s1471_s15, 3  ;;  %996 = vmatprep.subr.bf16.mxu0 %v995_v8  ;;  %1036 = vmatpush3.bf16.msra.mxu1 %v999_v11  ;;  %p1092_p1 = scmp.lt.s32.totalorder %s1090_s16, %s1084_s12 }
  0x17   : > { %s1273_s19 = scalar_lea.vmem %s1457_s0, %s820_s11  ;;  %1029 = vmatprep.subr.bf16.mxu1 %v1003_v16  ;;  %p1087_p13 = pneg %p1086_p12 }
  0x18   : > { %v267_v14 = vld [vmem:[%s1273_s19] sm:$0xff]  ;;  %v268_v15 = vld [vmem:[%s1273_s19 + $0x8] sm:$0xff]  ;;  %v269_v17 = vld [vmem:[%s1273_s19 + $0x10] sm:$0xff]  ;;  %p1093_p2 = por %p1092_p1, %p1091_p0 }
  0x19   : > { %907 = vmatprep.mubr.msk.f32.mxu0 %vm294_vm0, %v267_v14  ;;  %v270_v20 = vld [vmem:[%s1273_s19 + $0x18] sm:$0xff]  ;;  %v271_v22 = vld [vmem:[%s1273_s19 + $0x20] sm:$0xff]  ;;  %v272_v25 = vld [vmem:[%s1273_s19 + $0x28] sm:$0xff] }
  0x1a   : > { %908 = vmatmul.mubr.msk.f32.vlgmr.msra.gmra.mrb[0].mxu0 %vm294_vm0, %v268_v15  ;;  %1037 = vmatpush3.bf16.msra.mxu1 %v1003_v16  ;;  %v273_v27 = vld [vmem:[%s1273_s19 + $0x30] sm:$0xff]  ;;  %v274_v30 = vld [vmem:[%s1273_s19 + $0x38] sm:$0xff]  ;;  %v275_v32 = vld [vmem:[%s1273_s19 + $0x40] sm:$0xff]  ;;  %p1094_p3 = pnand %p1093_p2, %p1087_p13 }
  0x1b   : > { %910 = vmatprep.mubr.msk.f32.mxu0 %vm294_vm0, %v269_v17  ;;  %998 = vmatpush3.bf16.msra.mxu0 %v995_v8  ;;  %v276_v35 = vld [vmem:[%s1273_s19 + $0x48] sm:$0xff]  ;;  %v277_v37 = vld [vmem:[%s1273_s19 + $0x50] sm:$0xff]  ;;  %v278_v38 = vld [vmem:[%s1273_s19 + $0x58] sm:$0xff] }
  0x1c   : > { %1000 = vmatprep.subr.bf16.mxu0 %v999_v11  ;;  %1030 = vmatprep.subr.bf16.mxu1 %v1007_v21  ;;  %v279_v39 = vld [vmem:[%s1273_s19 + $0x60] sm:$0xff]  ;;  %v280_v40 = vld [vmem:[%s1273_s19 + $0x68] sm:$0xff]  ;;  %v281_v41 = vld [vmem:[%s1273_s19 + $0x70] sm:$0xff] }
  0x1d   : > { %v282_v42 = vld [vmem:[%s1273_s19 + $0x78] sm:$0xff] }
  0x1e   : > { %911 = vmatmul.mubr.msk.f32.gmra.mrb[2].mxu0 %vm294_vm0, %v270_v20  ;;  %1038 = vmatpush3.bf16.msra.mxu1 %v1007_v21 }
  0x1f   : > { %913 = vmatprep.mubr.msk.f32.mxu0 %vm294_vm0, %v271_v22  ;;  %1002 = vmatpush3.bf16.msra.mxu0 %v999_v11 }
  0x20   : > { %1004 = vmatprep.subr.bf16.mxu0 %v1003_v16  ;;  %1031 = vmatprep.subr.bf16.mxu1 %v1011_v26 }
  0x22   : > { %914 = vmatmul.mubr.msk.f32.gmra.mrb[4].mxu0 %vm294_vm0, %v272_v25  ;;  %1039 = vmatpush3.bf16.msra.mxu1 %v1011_v26 }
  0x23   : > { %916 = vmatprep.mubr.msk.f32.mxu0 %vm294_vm0, %v273_v27  ;;  %1006 = vmatpush3.bf16.msra.mxu0 %v1003_v16 }
  0x24   : > { %1008 = vmatprep.subr.bf16.mxu0 %v1007_v21  ;;  %1032 = vmatprep.subr.bf16.mxu1 %v1015_v31 }
  0x26   : > { %917 = vmatmul.mubr.msk.f32.gmra.mrb[6].mxu0 %vm294_vm0, %v274_v30  ;;  %1040 = vmatpush3.bf16.msra.mxu1 %v1015_v31 }
  0x27   : > { %919 = vmatprep.mubr.msk.f32.mxu0 %vm294_vm0, %v275_v32  ;;  %1010 = vmatpush3.bf16.msra.mxu0 %v1007_v21 }
  0x28   : > { %1012 = vmatprep.subr.bf16.mxu0 %v1011_v26  ;;  %1033 = vmatprep.subr.bf16.mxu1 %v1019_v36 }
  0x2a   : > { %920 = vmatmul.mubr.msk.f32.gmra.mrb[8].mxu0 %vm294_vm0, %v276_v35  ;;  %1041 = vmatpush3.bf16.msra.mxu1 %v1019_v36 }
  0x2b   : > { %922 = vmatprep.mubr.msk.f32.mxu0 %vm294_vm0, %v277_v37  ;;  %1014 = vmatpush3.bf16.msra.mxu0 %v1011_v26 }
  0x2c   : > { %1016 = vmatprep.subr.bf16.mxu0 %v1015_v31  ;;  %1034 = vmatprep.subr.bf16.mxu1 %v1023_v45 }
  0x2e   : > { %923 = vmatmul.mubr.msk.f32.gmra.mrb[10].mxu0 %vm294_vm0, %v278_v38  ;;  %1042 = vmatpush3.bf16.msra.mxu1 %v1023_v45 }
  0x2f   : > { %925 = vmatprep.mubr.msk.f32.mxu0 %vm294_vm0, %v279_v39  ;;  %1018 = vmatpush3.bf16.msra.mxu0 %v1015_v31 }
  0x30   : > { %1020 = vmatprep.subr.bf16.mxu0 %v1019_v36 }
  0x32   : > { %926 = vmatmul.mubr.msk.f32.gmra.mrb[12].mxu0 %vm294_vm0, %v280_v40 }
  0x33   : > { %928 = vmatprep.mubr.msk.f32.mxu0 %vm294_vm0, %v281_v41  ;;  %1022 = vmatpush3.bf16.msra.mxu0 %v1019_v36 }
  0x34   : > { %1024 = vmatprep.subr.bf16.mxu0 %v1023_v45 }
  0x36   : > { %929 = vmatmul.mubr.msk.f32.gmra.mrb[14].mxu0 %vm294_vm0, %v282_v42 }
  0x37   : > { %1026 = vmatpush3.bf16.msra.mxu0 %v1023_v45 }
  0xed   : > { %v909_v47 = vpop.f32.mrb[0].mxu0 }
  0xee   : > { %v415_v48 = vadd.f32 %v909_v47, %v1343_v46  ;;  %v409_v49 = vpop.f32.mrb[1].mxu0 }
  0xef   : > { %v410_v50 = vadd.f32 %v1343_v46, %v409_v49 }
  0xf0   : > { %489 = vst [vmem:[%s1347_s18 + $0x8] sm:$0xff] %v415_v48  ;;  %v505_v53 = vmax.f32 %v415_v48, 0.0 }
  0xf1   : > { %488 = vst [vmem:[%s1347_s18] sm:$0xff] %v410_v50  ;;  %v504_v51 = vmax.f32 %v410_v50, 0.0  ;;  %v912_v52 = vpop.f32.mrb[2].mxu0 }
  0xf2   : > { %v425_v54 = vadd.f32 %v912_v52, %v1343_v46  ;;  %v419_v55 = vpop.f32.mrb[3].mxu0 }
  0xf3   : > { %v420_v56 = vadd.f32 %v1343_v46, %v419_v55  ;;  %963 = vmatprep.mubr.f32.mxu0 %v504_v51 }
  0xf4   : > { %491 = vst [vmem:[%s1347_s18 + $0x18] sm:$0xff] %v425_v54  ;;  %964 = vmatmul.mubr.f32.vlgmr.msra.gmra.mrb[16].mxu0 %v505_v53  ;;  %v507_v59 = vmax.f32 %v425_v54, 0.0 }
  0xf5   : > { %490 = vst [vmem:[%s1347_s18 + $0x10] sm:$0xff] %v420_v56  ;;  %v506_v57 = vmax.f32 %v420_v56, 0.0  ;;  %v915_v58 = vpop.f32.mrb[4].mxu0 }
  0xf6   : > { %v435_v60 = vadd.f32 %v915_v58, %v1343_v46  ;;  %v429_v61 = vpop.f32.mrb[5].mxu0 }
  0xf7   : > { %v430_v62 = vadd.f32 %v1343_v46, %v429_v61  ;;  %966 = vmatprep.mubr.f32.mxu0 %v506_v57 }
  0xf8   : > { %493 = vst [vmem:[%s1347_s18 + $0x28] sm:$0xff] %v435_v60  ;;  %967 = vmatmul.mubr.f32.gmra.mrb[18].mxu0 %v507_v59  ;;  %v509_v1 = vmax.f32 %v435_v60, 0.0 }
  0xf9   : > { %492 = vst [vmem:[%s1347_s18 + $0x20] sm:$0xff] %v430_v62  ;;  %v508_v63 = vmax.f32 %v430_v62, 0.0  ;;  %v918_v0 = vpop.f32.mrb[6].mxu0 }
  0xfa   : > { %v445_v2 = vadd.f32 %v918_v0, %v1343_v46  ;;  %v439_v3 = vpop.f32.mrb[7].mxu0 }
  0xfb   : > { %v440_v4 = vadd.f32 %v1343_v46, %v439_v3  ;;  %969 = vmatprep.mubr.f32.mxu0 %v508_v63 }
  0xfc   : > { %495 = vst [vmem:[%s1347_s18 + $0x38] sm:$0xff] %v445_v2  ;;  %970 = vmatmul.mubr.f32.gmra.mrb[20].mxu0 %v509_v1  ;;  %v511_v7 = vmax.f32 %v445_v2, 0.0 }
  0xfd   : > { %494 = vst [vmem:[%s1347_s18 + $0x30] sm:$0xff] %v440_v4  ;;  %v921_v5 = vpop.f32.mrb[8].mxu0  ;;  %v510_v6 = vmax.f32 %v440_v4, 0.0 }
  0xfe   : > { %v455_v8 = vadd.f32 %v921_v5, %v1343_v46  ;;  %v449_v9 = vpop.f32.mrb[9].mxu0 }
  0xff   : > { %v450_v10 = vadd.f32 %v1343_v46, %v449_v9  ;;  %972 = vmatprep.mubr.f32.mxu1 %v510_v6 }
 0x100   : > { %497 = vst [vmem:[%s1347_s18 + $0x48] sm:$0xff] %v455_v8  ;;  %973 = vmatmul.mubr.f32.vlgmr.msra.gmra.mrb[0].mxu1 %v511_v7  ;;  %v513_v13 = vmax.f32 %v455_v8, 0.0 }
 0x101   : > { %496 = vst [vmem:[%s1347_s18 + $0x40] sm:$0xff] %v450_v10  ;;  %v512_v11 = vmax.f32 %v450_v10, 0.0  ;;  %v924_v12 = vpop.f32.mrb[10].mxu0 }
 0x102   : > { %v465_v14 = vadd.f32 %v924_v12, %v1343_v46  ;;  %v459_v15 = vpop.f32.mrb[11].mxu0 }
 0x103   : > { %v460_v16 = vadd.f32 %v1343_v46, %v459_v15  ;;  %975 = vmatprep.mubr.f32.mxu1 %v512_v11 }
 0x104   : > { %499 = vst [vmem:[%s1347_s18 + $0x58] sm:$0xff] %v465_v14  ;;  %976 = vmatmul.mubr.f32.gmra.mrb[2].mxu1 %v513_v13  ;;  %v515_v19 = vmax.f32 %v465_v14, 0.0 }
 0x105   : > { %498 = vst [vmem:[%s1347_s18 + $0x50] sm:$0xff] %v460_v16  ;;  %v514_v17 = vmax.f32 %v460_v16, 0.0  ;;  %v927_v18 = vpop.f32.mrb[12].mxu0 }
 0x106   : > { %v475_v20 = vadd.f32 %v927_v18, %v1343_v46  ;;  %v469_v21 = vpop.f32.mrb[13].mxu0 }
 0x107   : > { %v470_v22 = vadd.f32 %v1343_v46, %v469_v21  ;;  %978 = vmatprep.mubr.f32.mxu1 %v514_v17 }
 0x108   : > { %501 = vst [vmem:[%s1347_s18 + $0x68] sm:$0xff] %v475_v20  ;;  %979 = vmatmul.mubr.f32.gmra.mrb[4].mxu1 %v515_v19  ;;  %v517_v25 = vmax.f32 %v475_v20, 0.0 }
 0x109   : > { %500 = vst [vmem:[%s1347_s18 + $0x60] sm:$0xff] %v470_v22  ;;  %v516_v23 = vmax.f32 %v470_v22, 0.0  ;;  %v930_v24 = vpop.f32.mrb[14].mxu0 }
 0x10a   : > { %v485_v26 = vadd.f32 %v930_v24, %v1343_v46  ;;  %v479_v27 = vpop.f32.mrb[15].mxu0 }
 0x10b   : > { %v480_v28 = vadd.f32 %v1343_v46, %v479_v27  ;;  %981 = vmatprep.mubr.f32.mxu1 %v516_v23 }
 0x10c   : > { %503 = vst [vmem:[%s1347_s18 + $0x78] sm:$0xff] %v485_v26  ;;  %982 = vmatmul.mubr.f32.gmra.mrb[6].mxu1 %v517_v25  ;;  %v519_v30 = vmax.f32 %v485_v26, 0.0 }
 0x10d   : > { %502 = vst [vmem:[%s1347_s18 + $0x70] sm:$0xff] %v480_v28  ;;  %v518_v29 = vmax.f32 %v480_v28, 0.0 }
 0x10f   : > { %984 = vmatprep.mubr.f32.mxu1 %v518_v29 }
 0x110   : > { %985 = vmatmul.mubr.f32.gmra.mrb[8].mxu1 %v519_v30 }
 0x111   : > { %1097 = shalt.err (!%p1094_p3)
}
 0x112   : > { %s1098_s14 = scalar_lea.hbm %s1384_s9, 2048  ;;  %s1102_s18 = scalar_lea.hbm %s1463_s6, 8192 }
 0x113   : > { %p1099_p4 = scmp.ne.s32.totalorder %s1384_s9, %s1098_s14  ;;  %p1103_p9 = scmp.lt.u32.totalorder %s1384_s9, %s1463_s6 }
 0x114   : > { %p1104_p10 = scmp.lt.u32.totalorder %s1102_s18, %s1098_s14  ;;  %p1106_p12 = scmp.lt.u32.totalorder %s1098_s14, %s1384_s9 }
 0x115   : > { %p1100_p7 = pnand %p1099_p4, %p1224_p5 }
 0x116   : > { %p1105_p11 = por %p1104_p10, %p1103_p9 }
 0x117   : > { %p1101_p8 = pneg %p1100_p7 }
 0x118   : > { %p1107_p13 = por %p1106_p12, %p1105_p11 }
 0x11a   : > { %p1108_p0 = pnand %p1107_p13, %p1101_p8 }
 0x11c   : > { %1111 = shalt.err (!%p1108_p0)
}
 0x11d   : > { %s1149_s29 = smov 128   ;;  %s1150_s12 = smov 8   ;;  %v840_v31 = vld [vmem:[%s1461_s4] ss:$0 sm:$0xff] }
 0x11e   : > { %1043 = dma.vmem_to_hbm [thread:$0]  (%p1224_p5), %s1386_s26, 2048, %s1384_s9, %s1390_s10, %s1149_s29, %s1149_s29, %s1150_s12  }
 0x11f   : > { %s1422_s14 = scalar_lea.vmem %s1462_s5, %s820_s11 }
 0x1c7   : > { %v965_v32 = vpop.f32.mrb[16].mxu0 }
 0x1c8   : > { %v615_v33 = vadd.f32 %v965_v32, %v840_v31  ;;  %v609_v34 = vpop.f32.mrb[17].mxu0 }
 0x1c9   : > { %v610_v35 = vadd.f32 %v840_v31, %v609_v34 }
 0x1ca   : > { %689 = vst [vmem:[%s1422_s14 + $0x8] sm:$0xff] %v615_v33 }
 0x1cb   : > { %688 = vst [vmem:[%s1422_s14] sm:$0xff] %v610_v35  ;;  %v968_v36 = vpop.f32.mrb[18].mxu0 }
 0x1cc   : > { %v625_v37 = vadd.f32 %v968_v36, %v840_v31  ;;  %v619_v38 = vpop.f32.mrb[19].mxu0 }
 0x1cd   : > { %v620_v39 = vadd.f32 %v840_v31, %v619_v38 }
 0x1ce   : > { %691 = vst [vmem:[%s1422_s14 + $0x18] sm:$0xff] %v625_v37 }
 0x1cf   : > { %690 = vst [vmem:[%s1422_s14 + $0x10] sm:$0xff] %v620_v39  ;;  %v971_v40 = vpop.f32.mrb[20].mxu0 }
 0x1d0   : > { %v635_v41 = vadd.f32 %v971_v40, %v840_v31  ;;  %v629_v42 = vpop.f32.mrb[21].mxu0 }
 0x1d1   : > { %v630_v43 = vadd.f32 %v840_v31, %v629_v42 }
 0x1d2   : > { %693 = vst [vmem:[%s1422_s14 + $0x28] sm:$0xff] %v635_v41 }
 0x1d3   : > { %692 = vst [vmem:[%s1422_s14 + $0x20] sm:$0xff] %v630_v43  ;;  %v974_v44 = vpop.f32.mrb[0].mxu1 }
 0x1d4   : > { %v645_v45 = vadd.f32 %v974_v44, %v840_v31  ;;  %v639_v46 = vpop.f32.mrb[1].mxu1 }
 0x1d5   : > { %v640_v47 = vadd.f32 %v840_v31, %v639_v46 }
 0x1d6   : > { %695 = vst [vmem:[%s1422_s14 + $0x38] sm:$0xff] %v645_v45 }
 0x1d7   : > { %694 = vst [vmem:[%s1422_s14 + $0x30] sm:$0xff] %v640_v47  ;;  %v977_v48 = vpop.f32.mrb[2].mxu1 }
 0x1d8   : > { %v655_v49 = vadd.f32 %v977_v48, %v840_v31  ;;  %v649_v50 = vpop.f32.mrb[3].mxu1 }
 0x1d9   : > { %v650_v51 = vadd.f32 %v840_v31, %v649_v50 }
 0x1da   : > { %697 = vst [vmem:[%s1422_s14 + $0x48] sm:$0xff] %v655_v49 }
 0x1db   : > { %696 = vst [vmem:[%s1422_s14 + $0x40] sm:$0xff] %v650_v51  ;;  %v980_v52 = vpop.f32.mrb[4].mxu1 }
 0x1dc   : > { %v665_v53 = vadd.f32 %v980_v52, %v840_v31  ;;  %v659_v54 = vpop.f32.mrb[5].mxu1 }
 0x1dd   : > { %v660_v55 = vadd.f32 %v840_v31, %v659_v54 }
 0x1de   : > { %699 = vst [vmem:[%s1422_s14 + $0x58] sm:$0xff] %v665_v53 }
 0x1df   : > { %698 = vst [vmem:[%s1422_s14 + $0x50] sm:$0xff] %v660_v55  ;;  %v983_v56 = vpop.f32.mrb[6].mxu1 }
 0x1e0   : > { %v675_v57 = vadd.f32 %v983_v56, %v840_v31  ;;  %v669_v58 = vpop.f32.mrb[7].mxu1 }
 0x1e1   : > { %v670_v59 = vadd.f32 %v840_v31, %v669_v58 }
 0x1e2   : > { %701 = vst [vmem:[%s1422_s14 + $0x68] sm:$0xff] %v675_v57 }
 0x1e3   : > { %700 = vst [vmem:[%s1422_s14 + $0x60] sm:$0xff] %v670_v59  ;;  %v986_v60 = vpop.f32.mrb[8].mxu1 }
 0x1e4   : > { %v685_v61 = vadd.f32 %v986_v60, %v840_v31  ;;  %v679_v62 = vpop.f32.mrb[9].mxu1 }
 0x1e5   : > { %v680_v63 = vadd.f32 %v840_v31, %v679_v62 }
 0x1e6   : > { %703 = vst [vmem:[%s1422_s14 + $0x78] sm:$0xff] %v685_v61 }
 0x1e7   : > { %702 = vst [vmem:[%s1422_s14 + $0x70] sm:$0xff] %v680_v63 }
 0x1e8 PF: > { %p1049_p5 = scmp.ge.s32.totalorder %s1146_s24, 2  ;;  %s750_s7 = sand.u32 1, %s1134_s21  }
 0x1e9   : > { %s751_s15 = scalar_lea.sflag [#allocation3], %s750_s7 }
 0x1ea   : > { %p1046_p1 = pnand %p1049_p5, %p1228_p6 }
 0x1ec   : > { %1129 = dma.done.wait (!%p1046_p1), %s751_s15, 2048  }
 0x1ed   : > { %1131 = vsyncadd (!%p1046_p1), %s751_s15, 4294965248  ;;  %p17_p2 = scmp.ge.s32.totalorder %s1211_s27, 6   ;;  %s1466_s21 = smov %s1138_s22 }
 0x1ee   : > { %s1467_s22 = smov %s1142_s23  ;;  %s1468_s23 = smov %s1222_s30 }
 0x1ef   : > { %s1469_s24 = smov %s1211_s27  ;;  %19 = sbr.rel (!%p17_p2) target bundleno = 3 (0x3), region = 87 }
 0x1f6   :  { %756 = vsyncpa [#allocation3], 1 }
 0x1f7   :  { %758 = vsyncpa [#allocation3 + $0x1], 1 }

</bundles_post_ra>
